<compile_context>
chip_gen: v6e
topology: v6e:2x2x1
jax: 0.10.0
libtpu: 0.0.40
codegen_flags: <defaults>
</compile_context>

<pallas_src>
import functools

import numpy as np
import jax
import jax.numpy as jnp
from jax.experimental import pallas as pl
from jax.experimental.pallas import tpu as pltpu

_PV_DTYPE = jnp.bfloat16   # MXU operand dtype everywhere; accumulation stays f32
_MASK_BIAS = 1e9           # additive bias on non-edges (exp underflows to 0 in f32)
_NEG_SLOPE = 0.2           # leaky_relu slope used by HANConv


def _round_up(x, m):
    return ((x + m - 1) // m) * m


def _nd_tile_cap():
    """v5e MXU is 128-wide -> 128; v6e/v7x are 256-wide -> 256 (halves x_src
    re-streaming and fills the MXU M dimension)."""
    try:
        kind = jax.devices()[0].device_kind.lower()
    except Exception:
        return 256
    if "v5 lite" in kind or "v5e" in kind or "v5lite" in kind:
        return 128
    return 256


_ND_TILE_CAP = _nd_tile_cap()


def _attn_tiles(num_dst, num_src):
    """(nd_tile, ns_tile, Nd_pad, Ns_pad).  nd multiples of 32 / ns multiples of
    128 so the int8 adjacency tiles match the native (32, 128) int8 layout."""
    nd_tile = min(_ND_TILE_CAP, _round_up(num_dst, 32))
    ns_tile = min(512, _round_up(num_src, 128))
    return nd_tile, ns_tile, _round_up(num_dst, nd_tile), _round_up(num_src, ns_tile)


# ----------------------------- Linear (row-tiled) -----------------------------

def _linear_kernel(x_ref, w_ref, b_ref, o_ref):
    o_ref[...] = (jnp.dot(x_ref[...].astype(jnp.bfloat16),
                          w_ref[...].astype(jnp.bfloat16),
                          preferred_element_type=jnp.float32)
                  + b_ref[...]).astype(o_ref.dtype)


def linear(x, w, b, *, tm=256):
    """y = x @ w + b, tiled over the node axis; bf16 MXU operands, f32 accum."""
    M, K = x.shape
    N = w.shape[1]
    tm = min(tm, _round_up(M, 8))
    Mp = _round_up(M, tm)
    xp = x if Mp == M else jnp.pad(x, ((0, Mp - M), (0, 0)))
    out = pl.pallas_call(
        _linear_kernel,
        out_shape=jax.ShapeDtypeStruct((Mp, N), jnp.float32),
        grid=(Mp // tm,),
        in_specs=[
            pl.BlockSpec((tm, K), lambda i: (i, 0)),
            pl.BlockSpec((K, N), lambda i: (0, 0)),
            pl.BlockSpec((1, N), lambda i: (0, 0)),
        ],
        out_specs=pl.BlockSpec((tm, N), lambda i: (i, 0)),
        compiler_params=pltpu.CompilerParams(
            dimension_semantics=("parallel",)),
    )(xp, w, b)
    return out[:M]


# ----------------- Edge-type attention (flash-style, tiled) -------------------

def _edge_attn_kernel(cnt_ref, xs_ref, asrc_ref, adst_ref, adj_ref,
                      o_ref, m_ref, l_ref, acc_ref, *, heads, head_dim):
    i = pl.program_id(0)
    j = pl.program_id(1)
    nj = pl.num_programs(1)
    H, D = heads, head_dim

    @pl.when(j == 0)
    def _init():
        m_ref[...] = jnp.full(m_ref.shape, -1e30, m_ref.dtype)
        l_ref[...] = jnp.zeros_like(l_ref)
        acc_ref[...] = jnp.zeros_like(acc_ref)

    # Block-sparse skip: fully-masked (dst, src) tiles contribute exactly zero
    # (p = exp(.) * adj = 0 and l unchanged), so skipping them is exact.
    @pl.when(cnt_ref[i * nj + j] > 0)
    def _compute():
        adj = adj_ref[...].astype(jnp.float32)                  # [nd, ns] in {0,1}
        bias = (adj - 1.0) * _MASK_BIAS                         # additive mask bias
        a_src = asrc_ref[...]                                   # [H, ns]
        a_dst = adst_ref[...]                                   # [nd, H]
        xs = xs_ref[...]                                        # [ns, C] bf16
        for h in range(H):                                      # tiny static unroll
            cols = slice(h * D, (h + 1) * D)
            e = a_dst[:, h:h + 1] + a_src[h:h + 1, :]           # [nd, ns]
            e = jnp.maximum(e, _NEG_SLOPE * e) + bias           # leaky_relu + mask
            m_prev = m_ref[:, h:h + 1]                          # [nd, 1]
            m_new = jnp.maximum(m_prev, jnp.max(e, axis=-1, keepdims=True))
            p = jnp.exp(e - m_new) * adj                        # exact 0 off-edges
            corr = jnp.exp(m_prev - m_new)                      # [nd, 1]
            l_ref[:, h:h + 1] = (corr * l_ref[:, h:h + 1]
                                 + jnp.sum(p, axis=-1, keepdims=True))
            m_ref[:, h:h + 1] = m_new
            # bf16 MXU PV matmul into the per-head column slice of the f32 acc
            acc_ref[:, cols] = acc_ref[:, cols] * corr + jnp.dot(
                p.astype(_PV_DTYPE), xs[:, cols].astype(_PV_DTYPE),
                preferred_element_type=jnp.float32)

    @pl.when(j == nj - 1)
    def _finalize():
        # normalize AFTER the PV matmuls; per-head VPU scaling (no hmat matmuls)
        inv = pl.reciprocal(jnp.maximum(l_ref[...], 1e-20), approx=True)  # [nd, H]
        acc = acc_ref[...]
        parts = [acc[:, h * D:(h + 1) * D] * inv[:, h:h + 1] for h in range(H)]
        out = jnp.concatenate(parts, axis=-1)                   # [nd, C]
        o_ref[...] = jnp.maximum(out, 0.0).astype(o_ref.dtype)  # fused F.relu


def han_edge_attention(x_src, x_dst, a_src, a_dst, adj_and_counts, *, heads):
    """Masked multi-head graph attention for one edge type.

    x_src: [Ns, C], x_dst: [Nd, C], a_src/a_dst: [heads, C//heads],
    adj_and_counts: (int8 adj[Nd_pad, Ns_pad], int32 per-tile edge counts).
    Returns relu(attention output): [Nd, C] (lane-dense)."""
    adj_pad, counts = adj_and_counts
    Ns, C = x_src.shape
    Nd = x_dst.shape[0]
    H = heads
    D = C // H
    Nd_pad, Ns_pad = adj_pad.shape
    nd_tile, ns_tile, _, _ = _attn_tiles(Nd, Ns)

    # Per-node, per-head logits via one contraction each, hoisted out of the
    # tiled kernel (computed once, re-used by every tile).
    alpha_src = jnp.einsum("nhd,hd->hn", x_src.reshape(Ns, H, D), a_src)  # [H, Ns]
    alpha_dst = jnp.einsum("nhd,hd->nh", x_dst.reshape(Nd, H, D), a_dst)  # [Nd, H]

    xs = jnp.pad(x_src, ((0, Ns_pad - Ns), (0, 0))).astype(_PV_DTYPE)
    alpha_src = jnp.pad(alpha_src, ((0, 0), (0, Ns_pad - Ns)))
    alpha_dst = jnp.pad(alpha_dst, ((0, Nd_pad - Nd), (0, 0)))

    n_dst_tiles = Nd_pad // nd_tile
    grid = (n_dst_tiles, Ns_pad // ns_tile)
    cost = pl.CostEstimate(
        flops=int(2 * Nd_pad * Ns_pad * C + 10 * H * Nd_pad * Ns_pad),
        transcendentals=int(H * Nd_pad * Ns_pad),
        bytes_accessed=int(Nd_pad * Ns_pad                      # int8 adjacency
                           + 2 * n_dst_tiles * Ns_pad * C       # bf16 x_src restream
                           + 4 * Nd_pad * C                     # f32 output
                           + 4 * (H * Ns_pad + Nd_pad * H)))    # logits

    kernel = functools.partial(_edge_attn_kernel, heads=H, head_dim=D)
    out = pl.pallas_call(
        kernel,
        out_shape=jax.ShapeDtypeStruct((Nd_pad, C), jnp.float32),
        grid_spec=pltpu.PrefetchScalarGridSpec(
            num_scalar_prefetch=1,
            grid=grid,
            in_specs=[
                pl.BlockSpec((ns_tile, C), lambda i, j, c: (j, 0)),         # x_src
                pl.BlockSpec((H, ns_tile), lambda i, j, c: (0, j)),         # alpha_src
                pl.BlockSpec((nd_tile, H), lambda i, j, c: (i, 0)),         # alpha_dst
                pl.BlockSpec((nd_tile, ns_tile), lambda i, j, c: (i, j)),   # adj int8
            ],
            out_specs=pl.BlockSpec((nd_tile, C), lambda i, j, c: (i, 0)),
            scratch_shapes=[
                pltpu.VMEM((nd_tile, H), jnp.float32),   # running max m
                pltpu.VMEM((nd_tile, H), jnp.float32),   # running denom l
                pltpu.VMEM((nd_tile, C), jnp.float32),   # unnormalized PV acc
            ]),
        compiler_params=pltpu.CompilerParams(
            dimension_semantics=("parallel", "arbitrary"),
            vmem_limit_bytes=48 * 1024 * 1024),          # safe on v7x's 64 MiB too
        cost_estimate=cost,
    )(counts, xs, alpha_src, alpha_dst, adj_pad)
    return out[:Nd]


def edges_to_dense_adj(edge_index, num_src, num_dst):
    """int8 dense adj[dst, src] padded to the attention tile grid, plus int32
    per-(dst_tile, src_tile) edge counts (flattened) for block-sparse skipping.
    NOTE: duplicate edges collapse to 1 (duplicate-free edge lists assumed,
    matching the reference scatter-softmax semantics)."""
    nd_tile, ns_tile, Nd_pad, Ns_pad = _attn_tiles(num_dst, num_src)
    src, dst = edge_index[0], edge_index[1]
    adj = jnp.zeros((Nd_pad, Ns_pad), jnp.int8).at[dst, src].set(1)
    counts = adj.astype(jnp.int32).reshape(
        Nd_pad // nd_tile, nd_tile, Ns_pad // ns_tile, ns_tile
    ).sum(axis=(1, 3)).reshape(-1)
    return adj, counts


# -------------------- Semantic (edge-type level) attention --------------------

def _make_sem_ksum_kernel(num_edge_types):
    E = num_edge_types

    def kernel(*refs):
        out_refs = refs[:E]
        mask_ref, wk_ref, bk_ref, o_ref = refs[E:E + 4]

        @pl.when(pl.program_id(0) == 0)
        def _init():
            o_ref[...] = jnp.zeros_like(o_ref)

        mask = mask_ref[...]                                   # [tn, 1]
        wk = wk_ref[...].astype(jnp.bfloat16)                  # [C, C]
        bk = bk_ref[...]                                       # [1, C]
        rows = []
        for e in range(E):
            k = jnp.dot(out_refs[e][...].astype(jnp.bfloat16), wk,
                        preferred_element_type=jnp.float32)    # [tn, C]
            k = jnp.tanh(k + bk) * mask                        # drop padded rows
            rows.append(jnp.sum(k, axis=0, keepdims=True))     # [1, C]
        o_ref[...] = o_ref[...] + jnp.concatenate(rows, axis=0)

    return kernel


def _make_sem_combine_kernel(num_edge_types):
    E = num_edge_types

    def kernel(*refs):
        out_refs = refs[:E]
        beta_ref = refs[E]                                     # [E, 1]
        o_ref = refs[E + 1]
        acc = out_refs[0][...] * beta_ref[0:1, :]
        for e in range(1, E):
            acc = acc + out_refs[e][...] * beta_ref[e:e + 1, :]
        o_ref[...] = acc

    return kernel


def semantic_group(outs, wk, bk, q, num_valid, *, tn=256):
    """PyG HANConv `group`: beta = softmax_E(q . mean_N tanh(k_lin(out_e)));
    out = sum_e beta_e * out_e.  Per-edge-type outputs are passed as separate
    inputs (no HBM stack); the E-way softmax stays in plain JAX."""
    E = len(outs)
    N, C = outs[0].shape
    tn = min(tn, _round_up(N, 8))
    Np = _round_up(N, tn)
    outs_p = [o if Np == N else jnp.pad(o, ((0, Np - N), (0, 0))) for o in outs]
    mask = (jnp.arange(Np) < num_valid).astype(jnp.float32)[:, None]  # [Np, 1]

    ksum = pl.pallas_call(
        _make_sem_ksum_kernel(E),
        out_shape=jax.ShapeDtypeStruct((E, C), jnp.float32),
        grid=(Np // tn,),
        in_specs=[pl.BlockSpec((tn, C), lambda i: (i, 0)) for _ in range(E)] + [
            pl.BlockSpec((tn, 1), lambda i: (i, 0)),
            pl.BlockSpec((C, C), lambda i: (0, 0)),
            pl.BlockSpec((1, C), lambda i: (0, 0)),
        ],
        out_specs=pl.BlockSpec((E, C), lambda i: (0, 0)),
        compiler_params=pltpu.CompilerParams(
            dimension_semantics=("arbitrary",)),
    )(*outs_p, mask, wk, bk)

    # Tiny E-way semantic softmax (O(E*C) scalars) -> plain JAX.
    mean_k = ksum / jnp.float32(num_valid)
    score = mean_k @ q.reshape(-1, 1)                                 # [E, 1]
    beta = jax.nn.softmax(score, axis=0)                              # [E, 1]

    out = pl.pallas_call(
        _make_sem_combine_kernel(E),
        out_shape=jax.ShapeDtypeStruct((Np, C), jnp.float32),
        grid=(Np // tn,),
        in_specs=[pl.BlockSpec((tn, C), lambda i: (i, 0)) for _ in range(E)] + [
            pl.BlockSpec((E, 1), lambda i: (0, 0)),
        ],
        out_specs=pl.BlockSpec((tn, C), lambda i: (i, 0)),
        compiler_params=pltpu.CompilerParams(
            dimension_semantics=("parallel",)),
    )(*outs_p, beta)
    return out[:N], beta


# ------------------------------- Model glue ------------------------------------

def han_conv_forward(params, x_dict, adj_dict, edge_types, *, heads):
    """One HANConv layer (eval mode: dropout(0.6) = identity)."""
    # 1) per-node-type projection, kept lane-dense [N, hidden]
    x_proj = {nt: linear(x, params["proj"][nt]["w"], params["proj"][nt]["b"])
              for nt, x in x_dict.items() if x is not None}

    # 2) per-edge-type masked multi-head attention + relu
    out_lists = {nt: [] for nt in x_proj}
    for edge_type in edge_types:
        src_t, _, dst_t = edge_type
        if src_t not in x_proj or dst_t not in x_proj:
            continue
        et = "__".join(edge_type)
        out = han_edge_attention(x_proj[src_t], x_proj[dst_t],
                                 params["lin_src"][et], params["lin_dst"][et],
                                 adj_dict[edge_type], heads=heads)
        out_lists[dst_t].append(out)

    # 3) semantic attention across edge types, per destination node type
    new_x, sem_attn = {}, {}
    for nt, outs in out_lists.items():
        if len(outs) == 0:
            new_x[nt], sem_attn[nt] = None, None
            continue
        out, beta = semantic_group(outs, params["k_lin"]["w"],
                                   params["k_lin"]["b"], params["q"],
                                   num_valid=outs[0].shape[0])
        new_x[nt], sem_attn[nt] = out, beta
    return new_x, sem_attn


def han_forward(params, x_dict, edge_index_dict, labeled_class, *, heads):
    if labeled_class not in x_dict or x_dict[labeled_class] is None:
        return jnp.array([]), False
    # int8 padded adjacency + tile counts per edge type, built once, shared by
    # every layer (block-sparse skip uses the counts via scalar prefetch)
    adj_dict = {et: edges_to_dense_adj(ei, x_dict[et[0]].shape[0],
                                       x_dict[et[2]].shape[0])
                for et, ei in edge_index_dict.items()}
    edge_types = list(edge_index_dict.keys())
    for conv_params in params["convs"]:
        if labeled_class not in x_dict or x_dict[labeled_class] is None:
            return jnp.array([]), False
        x_dict, _sem_attn = han_conv_forward(conv_params, x_dict, adj_dict,
                                             edge_types, heads=heads)
    out = linear(x_dict[labeled_class], params["lin"]["w"], params["lin"]["b"])
    return out, True


def init_han_params(key, in_channels, out_channels, hidden, heads, n_layers, metadata):
    node_types, edge_types = metadata
    D = hidden // heads

    def dense(k, fan_in, fan_out):
        kw, kb = jax.random.split(k)
        lim = 1.0 / float(np.sqrt(fan_in))
        w = jax.random.uniform(kw, (fan_in, fan_out), jnp.float32, -lim, lim)
        b = jax.random.uniform(kb, (1, fan_out), jnp.float32, -lim, lim)
        return {"w": w, "b": b}

    convs = []
    in_c = dict(in_channels)
    for _ in range(n_layers):
        n_keys = len(node_types) + 2 * len(edge_types) + 3
        key, *ks = jax.random.split(key, n_keys + 1)
        it = iter(ks)
        conv = {
            "proj": {nt: dense(next(it), in_c[nt], hidden) for nt in node_types},
            "lin_src": {"__".join(et): 0.1 * jax.random.normal(next(it), (heads, D),
                                                               jnp.float32)
                        for et in edge_types},
            "lin_dst": {"__".join(et): 0.1 * jax.random.normal(next(it), (heads, D),
                                                               jnp.float32)
                        for et in edge_types},
            "k_lin": dense(next(it), hidden, hidden),
            "q": 0.1 * jax.random.normal(next(it), (1, hidden), jnp.float32),
        }
        convs.append(conv)
        in_c = {nt: hidden for nt in node_types}
    key, klin = jax.random.split(key)
    return {"convs": convs, "lin": dense(klin, hidden, out_channels)}


# ---------------------------------- Driver ------------------------------------

if __name__ == "__main__":
    key = jax.random.PRNGKey(0)
    metadata = (["author", "paper"],
                [("author", "writes", "paper"), ("paper", "rev_writes", "author")])
    in_channels = {"author": 8, "paper": 12}
    hidden, heads, out_ch, n_layers = 16, 4, 3, 1
    num_nodes = {"author": 12, "paper": 10}
    labeled_class = "paper"

    k_param, k_x, k_e = jax.random.split(key, 3)
    params = init_han_params(k_param, in_channels, out_ch, hidden, heads,
                             n_layers, metadata)

    ks = jax.random.split(k_x, len(metadata[0]))
    x_dict = {nt: jax.random.normal(ks[i], (num_nodes[nt], in_channels[nt]),
                                    jnp.float32)
              for i, nt in enumerate(metadata[0])}

    edge_index_dict = {}
    kes = jax.random.split(k_e, len(metadata[1]))
    for i, et in enumerate(metadata[1]):
        src_t, _, dst_t = et
        adj = jax.random.bernoulli(kes[i], 0.35,
                                   (num_nodes[dst_t], num_nodes[src_t]))
        dst_idx, src_idx = np.nonzero(np.asarray(adj))   # duplicate-free edge list
        edge_index_dict[et] = jnp.stack(
            [jnp.asarray(src_idx, jnp.int32), jnp.asarray(dst_idx, jnp.int32)], axis=0)

    out, ok = han_forward(params, x_dict, edge_index_dict, labeled_class,
                          heads=heads)
    jax.block_until_ready(out)
    assert ok and out.shape == (num_nodes[labeled_class], out_ch)
    print("KERNEL_OK")
</pallas_src>

<mosaic_0001>
module attributes {stable_mosaic.version = 11 : i64} {
  func.func @_linear_kernel(%arg0: i32, %arg1: memref<16x8xf32, #tpu.memory_space<vmem>>, %arg2: memref<8x16xf32, #tpu.memory_space<vmem>>, %arg3: memref<1x16xf32, #tpu.memory_space<vmem>>, %arg4: memref<16x16xf32, #tpu.memory_space<vmem>>) attributes {dimension_semantics = [#tpu.dimension_semantics<parallel>], iteration_bounds = array<i64: 1>, scalar_prefetch = 0 : i64, scratch_operands = 0 : i64, tpu.core_type = #tpu.core_type<tc>, window_params = [{transform_indices = @transform_0, window_bounds = array<i64: 16, 8>}, {pipeline_mode = #tpu.pipeline_mode<synchronous>, transform_indices = @transform_1, window_bounds = array<i64: 8, 16>}, {pipeline_mode = #tpu.pipeline_mode<synchronous>, transform_indices = @transform_2, window_bounds = array<i64: 1, 16>}, {transform_indices = @transform_3, window_bounds = array<i64: 16, 16>}]} {
    %c0 = arith.constant 0 : index
    %c0_0 = arith.constant 0 : index
    %0 = vector.load %arg1[%c0, %c0_0] : memref<16x8xf32, #tpu.memory_space<vmem>>, vector<16x8xf32>
    %1 = arith.truncf %0 : vector<16x8xf32> to vector<16x8xbf16>
    %c0_1 = arith.constant 0 : index
    %c0_2 = arith.constant 0 : index
    %2 = vector.load %arg2[%c0_1, %c0_2] : memref<8x16xf32, #tpu.memory_space<vmem>>, vector<8x16xf32>
    %3 = arith.truncf %2 : vector<8x16xf32> to vector<8x16xbf16>
    %cst = arith.constant dense<0.000000e+00> : vector<16x16xf32>
    %4 = tpu.matmul %1, %3, %cst {dimension_numbers = #tpu.dot_dimension_numbers<[1], [0], [0], [1], [0, 0, 1, 1], [], []>} : vector<16x8xbf16>, vector<8x16xbf16>, vector<16x16xf32> -> vector<16x16xf32>
    %c0_3 = arith.constant 0 : index
    %c0_4 = arith.constant 0 : index
    %5 = vector.load %arg3[%c0_3, %c0_4] : memref<1x16xf32, #tpu.memory_space<vmem>>, vector<1x16xf32>
    %6 = vector.broadcast %5 : vector<1x16xf32> to vector<16x16xf32>
    %7 = arith.addf %4, %6 : vector<16x16xf32>
    %c0_5 = arith.constant 0 : index
    %c0_6 = arith.constant 0 : index
    %8 = vector.load %arg4[%c0_5, %c0_6] : memref<16x16xf32, #tpu.memory_space<vmem>>, vector<16x16xf32>
    tpu.vector_store %arg4[%c0_5, %c0_6], %7 {strides = array<i32>} : memref<16x16xf32, #tpu.memory_space<vmem>>, vector<16x16xf32>,
    return
  }
  func.func @transform_0(%arg0: i32) -> (i32, i32) {
    %c0_i32 = arith.constant 0 : i32
    %c0_i32_0 = arith.constant 0 : i32
    return %arg0, %c0_i32 : i32, i32
  }
  func.func @transform_1(%arg0: i32) -> (i32, i32) {
    %c0_i32 = arith.constant 0 : i32
    %c0_i32_0 = arith.constant 0 : i32
    %c0_i32_1 = arith.constant 0 : i32
    return %c0_i32, %c0_i32_0 : i32, i32
  }
  func.func @transform_2(%arg0: i32) -> (i32, i32) {
    %c0_i32 = arith.constant 0 : i32
    %c0_i32_0 = arith.constant 0 : i32
    %c0_i32_1 = arith.constant 0 : i32
    return %c0_i32, %c0_i32_0 : i32, i32
  }
  func.func @transform_3(%arg0: i32) -> (i32, i32) {
    %c0_i32 = arith.constant 0 : i32
    %c0_i32_0 = arith.constant 0 : i32
    return %arg0, %c0_i32 : i32, i32
  }
}

</mosaic_0001>

<bundles_post_ra>
// kernel: tpu_custom_call.1
= control target key start
LH: loop header
LB: loop body
LE: loop exit
PB: predicated region body
PF: predicated region fallthrough
CT: control target
= control target key end

     0   :  { %vm32_vm0 = vcmask 1043456   ;;  %v133_v3 = vmov 0.0   ;;  %vm134_vm1 = vmmov 0   ;;  %s173_s0 = inlined_call_operand.vmem [shape: f32[16,8], index: 0, kind: input, shape index: {}]   ;;  %s174_s1 = inlined_call_operand.vmem [shape: f32[8,16], index: 1, kind: input, shape index: {}]   ;;  %s175_s2 = inlined_call_operand.vmem [shape: f32[1,16], index: 2, kind: input, shape index: {}]   ;;  %s176_s3 = inlined_call_operand.hbm [shape: f32[16,16], index: 3, kind: output, shape index: {}]  }
   0x1   :  { %v19_v0 = vld [vmem:[%s174_s1] sm:$0xff]  ;;  %v17_v2 = vld [vmem:[%s173_s0 + $0x8] sm:$0xff]  ;;  %100 = vmatprep.subr.bf16.mxu0 %v133_v3  ;;  %102 = vmatprep.mubr.msk.bf16.mxu0 %vm134_vm1, %v133_v3 }
   0x2   :  { %v16_v1 = vld [vmem:[%s173_s0] sm:$0xff]  ;;  %v20_v4 = vpack.c.bf16 %v19_v0, %v19_v0 }
   0x3   :  { %8 = vsyncpa [#allocation3], 0  ;;  %v18_v6 = vpack.c.bf16 %v17_v2, %v16_v1  ;;  %vm28_vm2 = vcmask 64512   ;;  %v96_v7 = vld [vmem:[%s175_s2] ss:$0 sm:$0xff]  ;;  %vm77_vm3 = vcmask 130048  }
   0x4   :  { %v34_v5 = vsel %vm32_vm0, %v20_v4, 0  ;;  %s135_s19 = smov [#allocation2]  }
   0x5   :  { %101 = vmatpush3.bf16.msra.mxu0 %v34_v5  ;;  %s85_s0 = sshll.u32 %s135_s19, 4  ;;  %s86_s0 = int_to_ptr.vmem [resolvable:$true] %s85_s0 }
   0x6   :  { %s111_s20 = scalar_lea.vmem %s86_s0, 256  ;;  %p116_p1 = scmp.lt.s32.totalorder %s86_s0, %s86_s0 }
   0x7   :  { %p112_p0 = scmp.ne.s32.totalorder %s86_s0, %s111_s20  ;;  %p117_p2 = scmp.lt.s32.totalorder %s111_s20, %s111_s20 }
   0x8   :  { %103 = vmatmul.mubr.msk.bf16.vlgmr.msra.gmra.mxu0 %vm28_vm2, %v18_v6 }
   0x9   :  { %p118_p3 = por %p117_p2, %p116_p1 }
   0xb   :  { %p119_p4 = pnand %p118_p3, %p112_p0 }
  0xc8   :  { %v70_v8 = vpop.f32.mrf.mxu0 }
  0xc9   :  { %v71_v9 = vadd.f32 %v96_v7, %v70_v8 }
  0xca   :  { %v104_v10 = vpop.f32.mrf.mxu0 }
  0xcb   :  { %78 = vst.msk [vmem:[#allocation2] sm:$0xff] %vm77_vm3, %v71_v9 }
  0xcc   :  { %v73_v11 = vpop.f32.mrf.mxu0 }
  0xcd   :  { %v74_v12 = vadd.f32 %v96_v7, %v73_v11 }
  0xce   :  { %v105_v13 = vpop.f32.mrf.mxu0 }
  0xcf   :  { %79 = vst.msk [vmem:[#allocation2 + $0x8] sm:$0xff] %vm77_vm3, %v74_v12 }
  0xd0   :  { %122 = shalt.err (!%p119_p4)
}
  0xd1   :  { %s136_s2 = smov 128   ;;  %s137_s21 = smov 8  }
  0xd2   :  { %91 = dma.vmem_to_hbm [thread:$0]  %s86_s0, 256, %s176_s3, [#allocation3], %s136_s2, %s136_s2, %s137_s21  }
  0xd3   :  { %131 = dma.done.wait [#allocation3], 256  }
  0xd4   :  { %132 = vsyncadd [#allocation3], 4294967040 }
  0xd5   :  { %95 = vsyncpa [#allocation3], 1 }

</bundles_post_ra>
